<compile_context>
chip_gen: v7x
topology: tpu7x:2x2x1
jax: 0.10.0
libtpu: 0.0.40
codegen_flags: <defaults>
</compile_context>

<pallas_src>
import jax
import jax.numpy as jnp
from jax.experimental import pallas as pl
from jax.experimental.pallas import tpu as pltpu

EPS = 1e-5


def mlp_kernel(x_ref, w1_ref, gamma_ref, beta_ref, w2_ref, o_ref):
    """One (core-half c, H-tile k) grid step.

    o_ref is the resident [B, Dout] f32 partial-sum block for this core-half
    (its index_map is constant along the reduction axis k), so it doubles as
    the accumulator -- no separate VMEM scratch or finalize copy.
    """
    k = pl.program_id(1)

    @pl.when(k == 0)
    def _():
        o_ref[...] = jnp.zeros_like(o_ref)

    # First linear for this H-tile: f32 x cast to bf16 in-kernel (its block is
    # grid-constant, DMA'd once); weights are already persistently bf16.
    h = jnp.dot(x_ref[...].astype(jnp.bfloat16), w1_ref[...],
                preferred_element_type=jnp.float32)              # [B, tH] f32

    # BatchNorm1d (training mode, biased variance) over the batch dim, folded
    # into a single per-feature scale/shift FMA.  All BN math stays f32.
    inv_b = 1.0 / x_ref.shape[0]
    mean = jnp.sum(h, axis=0, keepdims=True) * inv_b             # [1, tH]
    mean_sq = jnp.sum(h * h, axis=0, keepdims=True) * inv_b      # [1, tH]
    var = jnp.maximum(mean_sq - mean * mean, 0.0)                # biased var
    inv_std = jax.lax.rsqrt(var + EPS)                           # EUP slot
    scale = inv_std * gamma_ref[...]                             # [1, tH]
    shift = beta_ref[...] - mean * scale                         # [1, tH]

    # Fused normalize + affine + ReLU.
    hr = jnp.maximum(h * scale + shift, 0.0)

    # Second linear: accumulate the H reduction directly into the output block.
    o_ref[...] += jnp.dot(hr.astype(jnp.bfloat16), w2_ref[...],
                          preferred_element_type=jnp.float32)


def prepare_params(w1_t, gamma, beta, w2_t, b2):
    """One-time parameter prep (call once, reuse every forward): matmul
    weights live persistently in bf16 in HBM; BN/bias params stay f32."""
    return (jnp.asarray(w1_t, jnp.bfloat16),
            jnp.asarray(gamma, jnp.float32).reshape(1, -1),
            jnp.asarray(beta, jnp.float32).reshape(1, -1),
            jnp.asarray(w2_t, jnp.bfloat16),
            jnp.asarray(b2, jnp.float32).reshape(1, -1))


def _vmem_budget_bytes():
    try:
        cap = pltpu.get_tpu_info().vmem_capacity_bytes
    except Exception:
        cap = 64 * 1024 * 1024  # conservative fallback: v7x per-TC physical VMEM
    # Keep headroom for compiler-internal scratch / semaphores.
    return min(cap * 3 // 4, 112 * 1024 * 1024)


def _pick_tile_h(h_half, din, dout, b, budget_bytes):
    """Largest H-tile (multiple of 128, divides h_half) whose double-buffered
    bf16 weight tiles + resident x/out blocks + f32 temporaries fit budget."""
    fixed = 2 * b * din * 4 + 2 * b * dout * 4         # x + out blocks (2 bufs)
    per_h = 2 * 2 * (din + dout)                       # 2-buf bf16 W1/W2 tiles
    per_h += 2 * 2 * 4 * 2                             # gamma/beta tiles
    per_h += 2 * b * 4                                 # in-kernel h / hr temps
    avail = max(budget_bytes - fixed - (4 << 20), per_h * 128)
    th = min(h_half, max(128, (avail // per_h) // 128 * 128))
    while h_half % th:
        th -= 128
    return th


def mlp_forward(x, params, *, tile_h=None, num_parallel=2):
    w1_bf, gamma, beta, w2_bf, b2 = params
    B, Din = x.shape
    H = w1_bf.shape[1]
    Dout = w2_bf.shape[1]
    assert w1_bf.dtype == jnp.bfloat16 and w2_bf.dtype == jnp.bfloat16
    assert H % (num_parallel * 128) == 0
    h_half = H // num_parallel

    budget = _vmem_budget_bytes()
    if tile_h is None:
        tile_h = _pick_tile_h(h_half, Din, Dout, B, budget)
    assert h_half % tile_h == 0 and tile_h % 128 == 0
    steps = h_half // tile_h

    # Size the scoped-VMEM request from the actual tiling (never the whole chip).
    est = (2 * B * Din * 4 + 2 * B * Dout * 4
           + 2 * 2 * (Din + Dout) * tile_h
           + 2 * B * tile_h * 4 + (8 << 20))
    vmem_limit = max(32 * 1024 * 1024, min(budget, est))

    cost = pl.CostEstimate(
        flops=2 * B * Din * H + 2 * B * H * Dout,
        transcendentals=H,
        bytes_accessed=(x.size * 4 + w1_bf.size * 2 + w2_bf.size * 2
                        + gamma.size * 4 + beta.size * 4
                        + num_parallel * B * Dout * 4),
    )

    grid_spec = pltpu.PrefetchScalarGridSpec(
        num_scalar_prefetch=0,
        grid=(num_parallel, steps),          # (H-half: parallel, H-tile: reduce)
        in_specs=[
            pl.BlockSpec((B, Din), lambda c, k: (0, 0)),            # x (const)
            pl.BlockSpec((Din, tile_h), lambda c, k: (0, c * steps + k)),  # W1^T
            pl.BlockSpec((1, tile_h), lambda c, k: (0, c * steps + k)),    # gamma
            pl.BlockSpec((1, tile_h), lambda c, k: (0, c * steps + k)),    # beta
            pl.BlockSpec((tile_h, Dout), lambda c, k: (c * steps + k, 0)), # W2^T
        ],
        out_specs=pl.BlockSpec((None, B, Dout), lambda c, k: (c, 0, 0)),
    )

    partials = pl.pallas_call(
        mlp_kernel,
        out_shape=jax.ShapeDtypeStruct((num_parallel, B, Dout), jnp.float32),
        grid_spec=grid_spec,
        compiler_params=pltpu.CompilerParams(
            dimension_semantics=("parallel", "arbitrary"),
            vmem_limit_bytes=int(vmem_limit),
        ),
        cost_estimate=cost,
    )(x, w1_bf, gamma, beta, w2_bf)

    # Combine per-core partial sums and add the 2nd-linear bias (tiny trailing
    # XLA op; negligible vs. streaming W1/W2 in this bandwidth-bound regime).
    return partials.sum(axis=0) + b2


def reference_forward_f32(x, w1_t, gamma, beta, w2_t, b2):
    h = x @ w1_t
    mean = jnp.mean(h, axis=0, keepdims=True)
    var = jnp.mean((h - mean) ** 2, axis=0, keepdims=True)
    hn = (h - mean) / jnp.sqrt(var + EPS) * gamma + beta
    hr = jnp.maximum(hn, 0.0)
    return hr @ w2_t + b2


def reference_forward_bf16_ops(x, w1_t, gamma, beta, w2_t, b2):
    # Same dtype choices as the kernel: bf16 dot operands, f32 acc / BN math.
    h = jnp.dot(x.astype(jnp.bfloat16), w1_t.astype(jnp.bfloat16),
                preferred_element_type=jnp.float32)
    mean = jnp.mean(h, axis=0, keepdims=True)
    var = jnp.mean((h - mean) ** 2, axis=0, keepdims=True)
    hn = (h - mean) / jnp.sqrt(var + EPS) * gamma + beta
    hr = jnp.maximum(hn, 0.0)
    return jnp.dot(hr.astype(jnp.bfloat16), w2_t.astype(jnp.bfloat16),
                   preferred_element_type=jnp.float32) + b2


if __name__ == "__main__":
    # Small shapes consistent with MLP(input_dim, hidden_size, output_dim);
    # B=128 fills the MXU M dimension, all dims multiples of (8, 128).
    B, D_IN, HID, D_OUT = 128, 256, 512, 256

    key = jax.random.PRNGKey(0)
    kx, kw1, kw2, kb2 = jax.random.split(key, 4)

    x = jax.random.normal(kx, (B, D_IN), dtype=jnp.float32)

    # nn.Linear-style uniform init (deterministic).
    bound1 = 1.0 / (D_IN ** 0.5)
    w1_t = jax.random.uniform(kw1, (D_IN, HID), jnp.float32, -bound1, bound1)
    bound2 = 1.0 / (HID ** 0.5)
    w2_t = jax.random.uniform(kw2, (HID, D_OUT), jnp.float32, -bound2, bound2)
    b2 = jax.random.uniform(kb2, (1, D_OUT), jnp.float32, -bound2, bound2)

    # BatchNorm1d affine defaults: gamma=1, beta=0.
    gamma = jnp.ones((1, HID), jnp.float32)
    beta = jnp.zeros((1, HID), jnp.float32)

    # One-time parameter prep (persistent bf16 weights in HBM), then forward.
    params = prepare_params(w1_t, gamma, beta, w2_t, b2)
    out = mlp_forward(x, params)
    out = jax.block_until_ready(out)
    assert out.shape == (B, D_OUT)

    # Tight check against a reference with matching bf16 operand casts.
    ref_bf = reference_forward_bf16_ops(x, w1_t, gamma, beta, w2_t, b2)
    assert jnp.allclose(out, ref_bf, atol=2e-3, rtol=2e-3)

    # Looser check against the full-f32 PyTorch-semantics reference
    # (operands lose mantissa bits to bf16, accumulation stays f32).
    ref_f32 = reference_forward_f32(x, w1_t, gamma, beta, w2_t, b2)
    assert jnp.allclose(out, ref_f32, atol=3e-2, rtol=3e-2)

    print("KERNEL_OK")
</pallas_src>

<mosaic_0001>
module attributes {stable_mosaic.version = 11 : i64} {
  func.func @mlp_kernel(%arg0: i32, %arg1: i32, %arg2: memref<128x256xf32, #tpu.memory_space<vmem>>, %arg3: memref<256x256xbf16, #tpu.memory_space<vmem>>, %arg4: memref<1x256xf32, #tpu.memory_space<vmem>>, %arg5: memref<1x256xf32, #tpu.memory_space<vmem>>, %arg6: memref<256x256xbf16, #tpu.memory_space<vmem>>, %arg7: memref<1x128x256xf32, #tpu.memory_space<vmem>>) attributes {dimension_semantics = [#tpu.dimension_semantics<parallel>, #tpu.dimension_semantics<arbitrary>], iteration_bounds = array<i64: 2, 1>, scalar_prefetch = 0 : i64, scratch_operands = 0 : i64, tpu.core_type = #tpu.core_type<tc>, window_params = [{pipeline_mode = #tpu.pipeline_mode<synchronous>, transform_indices = @transform_0, window_bounds = array<i64: 128, 256>}, {transform_indices = @transform_1, window_bounds = array<i64: 256, 256>}, {transform_indices = @transform_2, window_bounds = array<i64: 1, 256>}, {transform_indices = @transform_3, window_bounds = array<i64: 1, 256>}, {transform_indices = @transform_4, window_bounds = array<i64: 256, 256>}, {transform_indices = @transform_5, window_bounds = array<i64: 1, 128, 256>}]} {
    %c0_i32 = arith.constant 0 : i32
    %0 = arith.cmpi eq, %arg1, %c0_i32 : i32
    %1 = arith.extui %0 : i1 to i32
    %c0_i32_0 = arith.constant 0 : i32
    %2 = arith.cmpi ne, %1, %c0_i32_0 : i32
    scf.if %2 {
      %cst_24 = arith.constant 0.000000e+00 : f32
      %43 = vector.broadcast %cst_24 : f32 to vector<128x256xf32>
      %c0_25 = arith.constant 0 : index
      %c0_26 = arith.constant 0 : index
      %c0_27 = arith.constant 0 : index
      %44 = vector.load %arg7[%c0_25, %c0_26, %c0_27] : memref<1x128x256xf32, #tpu.memory_space<vmem>>, vector<1x128x256xf32>
      %45 = vector.shape_cast %44 : vector<1x128x256xf32> to vector<128x256xf32>
      %46 = vector.shape_cast %43 : vector<128x256xf32> to vector<1x128x256xf32>
      tpu.vector_store %arg7[%c0_25, %c0_26, %c0_27], %46 {strides = array<i32>} : memref<1x128x256xf32, #tpu.memory_space<vmem>>, vector<1x128x256xf32>,
    } else {
    }
    %c0 = arith.constant 0 : index
    %c0_1 = arith.constant 0 : index
    %3 = vector.load %arg2[%c0, %c0_1] : memref<128x256xf32, #tpu.memory_space<vmem>>, vector<128x256xf32>
    %4 = arith.truncf %3 : vector<128x256xf32> to vector<128x256xbf16>
    %c0_2 = arith.constant 0 : index
    %c0_3 = arith.constant 0 : index
    %5 = vector.load %arg3[%c0_2, %c0_3] : memref<256x256xbf16, #tpu.memory_space<vmem>>, vector<256x256xbf16>
    %cst = arith.constant dense<0.000000e+00> : vector<128x256xf32>
    %6 = tpu.matmul %4, %5, %cst {dimension_numbers = #tpu.dot_dimension_numbers<[1], [0], [0], [1], [0, 0, 1, 1], [], []>} : vector<128x256xbf16>, vector<256x256xbf16>, vector<128x256xf32> -> vector<128x256xf32>
    %cst_4 = arith.constant dense<0.000000e+00> : vector<256xf32>
    %7 = vector.multi_reduction <add>, %6, %cst_4 [0] : vector<128x256xf32> to vector<256xf32>
    %8 = vector.shape_cast %7 : vector<256xf32> to vector<1x256xf32>
    %cst_5 = arith.constant 7.812500e-03 : f32
    %9 = vector.broadcast %cst_5 : f32 to vector<1x256xf32>
    %10 = arith.mulf %8, %9 : vector<1x256xf32>
    %11 = arith.mulf %6, %6 : vector<128x256xf32>
    %cst_6 = arith.constant dense<0.000000e+00> : vector<256xf32>
    %12 = vector.multi_reduction <add>, %11, %cst_6 [0] : vector<128x256xf32> to vector<256xf32>
    %13 = vector.shape_cast %12 : vector<256xf32> to vector<1x256xf32>
    %cst_7 = arith.constant 7.812500e-03 : f32
    %14 = vector.broadcast %cst_7 : f32 to vector<1x256xf32>
    %15 = arith.mulf %13, %14 : vector<1x256xf32>
    %16 = arith.mulf %10, %10 : vector<1x256xf32>
    %17 = arith.subf %15, %16 : vector<1x256xf32>
    %cst_8 = arith.constant 0.000000e+00 : f32
    %18 = vector.broadcast %cst_8 : f32 to vector<1x256xf32>
    %19 = arith.maximumf %17, %18 : vector<1x256xf32>
    %cst_9 = arith.constant 9.99999974E-6 : f32
    %20 = vector.broadcast %cst_9 : f32 to vector<1x256xf32>
    %21 = arith.addf %19, %20 : vector<1x256xf32>
    %22 = math.rsqrt %21 : vector<1x256xf32>
    %c0_10 = arith.constant 0 : index
    %c0_11 = arith.constant 0 : index
    %23 = vector.load %arg4[%c0_10, %c0_11] : memref<1x256xf32, #tpu.memory_space<vmem>>, vector<1x256xf32>
    %24 = arith.mulf %22, %23 : vector<1x256xf32>
    %c0_12 = arith.constant 0 : index
    %c0_13 = arith.constant 0 : index
    %25 = vector.load %arg5[%c0_12, %c0_13] : memref<1x256xf32, #tpu.memory_space<vmem>>, vector<1x256xf32>
    %26 = arith.mulf %10, %24 : vector<1x256xf32>
    %27 = arith.subf %25, %26 : vector<1x256xf32>
    %28 = vector.broadcast %24 : vector<1x256xf32> to vector<128x256xf32>
    %29 = arith.mulf %6, %28 : vector<128x256xf32>
    %30 = vector.broadcast %27 : vector<1x256xf32> to vector<128x256xf32>
    %31 = arith.addf %29, %30 : vector<128x256xf32>
    %cst_14 = arith.constant 0.000000e+00 : f32
    %32 = vector.broadcast %cst_14 : f32 to vector<128x256xf32>
    %33 = arith.maximumf %31, %32 : vector<128x256xf32>
    %c0_15 = arith.constant 0 : index
    %c0_16 = arith.constant 0 : index
    %c0_17 = arith.constant 0 : index
    %34 = vector.load %arg7[%c0_15, %c0_16, %c0_17] : memref<1x128x256xf32, #tpu.memory_space<vmem>>, vector<1x128x256xf32>
    %35 = vector.shape_cast %34 : vector<1x128x256xf32> to vector<128x256xf32>
    %36 = arith.truncf %33 : vector<128x256xf32> to vector<128x256xbf16>
    %c0_18 = arith.constant 0 : index
    %c0_19 = arith.constant 0 : index
    %37 = vector.load %arg6[%c0_18, %c0_19] : memref<256x256xbf16, #tpu.memory_space<vmem>>, vector<256x256xbf16>
    %cst_20 = arith.constant dense<0.000000e+00> : vector<128x256xf32>
    %38 = tpu.matmul %36, %37, %cst_20 {dimension_numbers = #tpu.dot_dimension_numbers<[1], [0], [0], [1], [0, 0, 1, 1], [], []>} : vector<128x256xbf16>, vector<256x256xbf16>, vector<128x256xf32> -> vector<128x256xf32>
    %39 = arith.addf %35, %38 : vector<128x256xf32>
    %c0_21 = arith.constant 0 : index
    %c0_22 = arith.constant 0 : index
    %c0_23 = arith.constant 0 : index
    %40 = vector.load %arg7[%c0_21, %c0_22, %c0_23] : memref<1x128x256xf32, #tpu.memory_space<vmem>>, vector<1x128x256xf32>
    %41 = vector.shape_cast %40 : vector<1x128x256xf32> to vector<128x256xf32>
    %42 = vector.shape_cast %39 : vector<128x256xf32> to vector<1x128x256xf32>
    tpu.vector_store %arg7[%c0_21, %c0_22, %c0_23], %42 {strides = array<i32>} : memref<1x128x256xf32, #tpu.memory_space<vmem>>, vector<1x128x256xf32>,
    return
  }
  func.func @transform_0(%arg0: i32, %arg1: i32) -> (i32, i32) {
    %c0_i32 = arith.constant 0 : i32
    %c0_i32_0 = arith.constant 0 : i32
    %c0_i32_1 = arith.constant 0 : i32
    return %c0_i32, %c0_i32_0 : i32, i32
  }
  func.func @transform_1(%arg0: i32, %arg1: i32) -> (i32, i32) {
    %c1_i32 = arith.constant 1 : i32
    %0 = arith.muli %arg0, %c1_i32 : i32
    %1 = arith.addi %0, %arg1 : i32
    %c0_i32 = arith.constant 0 : i32
    %c0_i32_0 = arith.constant 0 : i32
    return %c0_i32, %1 : i32, i32
  }
  func.func @transform_2(%arg0: i32, %arg1: i32) -> (i32, i32) {
    %c1_i32 = arith.constant 1 : i32
    %0 = arith.muli %arg0, %c1_i32 : i32
    %1 = arith.addi %0, %arg1 : i32
    %c0_i32 = arith.constant 0 : i32
    %c0_i32_0 = arith.constant 0 : i32
    return %c0_i32, %1 : i32, i32
  }
  func.func @transform_3(%arg0: i32, %arg1: i32) -> (i32, i32) {
    %c1_i32 = arith.constant 1 : i32
    %0 = arith.muli %arg0, %c1_i32 : i32
    %1 = arith.addi %0, %arg1 : i32
    %c0_i32 = arith.constant 0 : i32
    %c0_i32_0 = arith.constant 0 : i32
    return %c0_i32, %1 : i32, i32
  }
  func.func @transform_4(%arg0: i32, %arg1: i32) -> (i32, i32) {
    %c1_i32 = arith.constant 1 : i32
    %0 = arith.muli %arg0, %c1_i32 : i32
    %1 = arith.addi %0, %arg1 : i32
    %c0_i32 = arith.constant 0 : i32
    %c0_i32_0 = arith.constant 0 : i32
    return %1, %c0_i32 : i32, i32
  }
  func.func @transform_5(%arg0: i32, %arg1: i32) -> (i32, i32, i32) {
    %c0_i32 = arith.constant 0 : i32
    %c0_i32_0 = arith.constant 0 : i32
    %c0_i32_1 = arith.constant 0 : i32
    return %arg0, %c0_i32, %c0_i32_0 : i32, i32, i32
  }
}

</mosaic_0001>

<bundles_post_ra>
// kernel: tpu_custom_call.1
= control target key start
LH: loop header
LB: loop body
LE: loop exit
PB: predicated region body
PF: predicated region fallthrough
CT: control target
= control target key end

     0   :  { %s2756_s0 = inlined_call_operand.hbm [shape: f32[128,256], index: 0, kind: input, shape index: {}]   ;;  %s2757_s1 = inlined_call_operand.hbm [shape: bf16[256,512], index: 1, kind: input, shape index: {}]   ;;  %s2758_s2 = inlined_call_operand.vmem [shape: f32[1,512], index: 2, kind: input, shape index: {}]   ;;  %s2759_s3 = inlined_call_operand.vmem [shape: f32[1,512], index: 3, kind: input, shape index: {}]   ;;  %s2760_s4 = inlined_call_operand.hbm [shape: bf16[512,256], index: 4, kind: input, shape index: {}]   ;;  %s2761_s5 = inlined_call_operand.hbm [shape: f32[2,128,256], index: 5, kind: output, shape index: {}]  }
   0x1   :  { %2770 = sst [smem:[#allocation13_spill]] %s2757_s1 }
   0x2   :  { %2771 = sst [smem:[#allocation14_spill]] %s2760_s4 }
   0x3   :  { %10 = vsyncpa [#allocation3], 0 }
   0x4   :  { %11 = vsyncpa [#allocation6], 0 }
   0x5   :  { %13 = vsyncpa [#allocation6 + $0x1], 0 }
   0x6   :  { %14 = vsyncpa [#allocation4], 0 }
   0x7   :  { %16 = vsyncpa [#allocation4 + $0x1], 0  ;;  %s2099_s18 = smov 0   ;;  %s2101_s19 = smov 0  }
   0x8   :  { %s2103_s20 = smov 0   ;;  %s2105_s21 = smov 0  }
   0x9   :  { %s2107_s22 = smov 0   ;;  %s2109_s23 = smov 0  }
   0xa LB: > { %s34_s24 = sadd.s32 1, %s2052_s22  ;;  %s64_s25 = sadd.s32 1, %s2044_s20  ;;  %s2056_s23 = sphi %s2109_s23, %s22_s23   ;;  %s2052_s22 = sphi %s2107_s22, %s2797_s22   ;;  %s2048_s21 = sphi %s2105_s21, %s2796_s21   ;;  %s2044_s20 = sphi %s2103_s20, %s2795_s20   ;;  %s2040_s19 = sphi %s2101_s19, %s2794_s19   ;;  %s2036_s18 = sphi %s2099_s18, %s2793_s18  }
   0xb   : > { %p36_p0 = scmp.ge.s32.totalorder %s34_s24, 2  ;;  %p71_p1 = scmp.ne.s32.totalorder %s2044_s20, %s2040_s19 }
   0xc   : > { %p72_p2 = scmp.eq.s32.totalorder %s2056_s23, 0  ;;  %p1722_p5 = scmp.lt.s32.totalorder %s2056_s23, 2 }
   0xd   : > { %s2799_s24 = smov (%p36_p0, %s34_s24), 0  ;;  %s224_s28 = sand.u32 1, %s2056_s23  }
   0xe   : > { %2772 = sst [smem:[#allocation12_spill]] %s2799_s24  ;;  %p2139_p3 = por %p72_p2, %p71_p1 }
   0xf   : > { %s61_s27 = ssub.s32 %s2052_s22, %s2799_s24  ;;  %s226_s29 = sand.u32 1, %s2044_s20  }
  0x10   : > { %p62_p6 = scmp.eq.s32.totalorder %s61_s27, 0  ;;  %s2152_s6 = sshll.u32 %s226_s29, 8 }
  0x11   : > { %s1692_s7 = sshll.u32 %s2052_s22, 7  ;;  %s2774_s1 = sld [smem:[#allocation13_spill]] }
  0x12   : > { %s2150_s30 = scalar_select %p62_p6, %s2044_s20, %s64_s25  }
  0x13   : > { %s228_s11 = scalar_lea.vmem [#allocation5], %s2152_s6  ;;  %p2163_p7 = pnand %p1722_p5, %p2139_p3 }
  0x14   : > { %s236_s12 = sshll.u32 %s228_s11, 4  ;;  %s2169_s14 = scalar_lea.sflag [#allocation6], %s224_s28  ;;  %s2167_s12 = int_to_ptr.vmem [resolvable:$true] %s236_s12 }
  0x15   : > { %p1884_p9 = pneg %p2163_p7 }
  0x17   : > { %s2158_s10 = scalar_lea.hbm %s2774_s1, %s1692_s7  ;;  %s1887_s25 = scalar_lea.hbm %s2774_s1, 8192 }
  0x18   : > { %s1882_s15 = scalar_lea.hbm %s2158_s10, 4096  ;;  %p1888_p12 = scmp.lt.u32.totalorder %s2158_s10, %s2774_s1 }
  0x19   : > { %p1883_p8 = scmp.ne.s32.totalorder %s2158_s10, %s1882_s15  ;;  %p1889_p13 = scmp.lt.u32.totalorder %s1887_s25, %s1882_s15 }
  0x1a   : > { %p1891_p2 = scmp.lt.u32.totalorder %s1882_s15, %s2158_s10 }
  0x1b   : > { %p1885_p10 = pnand %p1884_p9, %p1883_p8  ;;  %p1890_p0 = por %p1889_p13, %p1888_p12 }
  0x1d   : > { %p1886_p11 = pneg %p1885_p10  ;;  %p1892_p3 = por %p1891_p2, %p1890_p0 }
  0x1f   : > { %p1893_p5 = pnand %p1892_p3, %p1886_p11 }
  0x21   : > { %1896 = shalt.err (!%p1893_p5)
}
  0x22   : > { %s1897_s28 = scalar_lea.vmem %s2167_s12, 4096  ;;  %s2058_s29 = smov [#allocation5]  }
  0x23   : > { %p1898_p6 = scmp.ne.s32.totalorder %s2167_s12, %s1897_s28  ;;  %s1902_s7 = sshll.u32 %s2058_s29, 4  ;;  %s1903_s7 = int_to_ptr.vmem [resolvable:$false] %s1902_s7 }
  0x24   : > { %s1904_s8 = scalar_lea.vmem %s1903_s7, 8192  ;;  %p1905_p4 = scmp.lt.s32.totalorder %s2167_s12, %s1903_s7 }
  0x25   : > { %p1900_p8 = pnand %p1898_p6, %p1884_p9  ;;  %p1906_p12 = scmp.lt.s32.totalorder %s1904_s8, %s1897_s28 }
  0x27   : > { %p1901_p10 = pneg %p1900_p8  ;;  %p1907_p13 = por %p1906_p12, %p1905_p4 }
  0x29   : > { %p1908_p0 = pnand %p1907_p13, %p1901_p10 }
  0x2b   : > { %1911 = shalt.err (!%p1908_p0)
}
  0x2c   : > { %s2762_s9 = smov 256   ;;  %s2763_s11 = smov 128  }
  0x2d   : > { %s2764_s15 = smov 8   ;;  %s2201_s16 = sadd.s32 4294967295, %s2056_s23  }
  0x2e   : > { %1713 = dma.hbm_to_vmem [thread:$0]  (!%p2163_p7), %s2158_s10, 4096, %s2167_s12, %s2169_s14, %s2762_s9, %s2763_s11, %s2764_s15  }
  0x2f   : > { %s1605_s17 = sadd.s32 4294967294, %s2056_s23   ;;  %p77_p4 = scmp.ne.s32.totalorder %s2040_s19, %s2036_s18 }
  0x30   : > { %p2765_p11 = scmp.eq.s32.totalorder %s2201_s16, 0  ;;  %p185_p2 = scmp.eq.s32.totalorder %s2201_s16, 1 }
  0x31   : > { %p191_p3 = scmp.eq.s32.totalorder %s1605_s17, 1  ;;  %p1606_p6 = scmp.ge.s32.totalorder %s2056_s23, 1 }
  0x32   : > { %p2210_p5 = por %p2765_p11, %p77_p4  ;;  %p2218_p8 = por %p185_p2, %p71_p1 }
  0x33   : > { %p2222_p10 = por %p191_p3, %p77_p4  ;;  %p198_p12 = scmp.lt.s32.totalorder %s2056_s23, 3 }
  0x34   : > { %s2776_s25 = scalar_select %p2210_p5, 1, 0 }
  0x35   : > { %s2777_s10 = scalar_select %p2218_p8, 1, 0 }
  0x36   : > { %s2778_s12 = scalar_select %p2222_p10, 1, 0 }
  0x37   : > { %p2227_p13 = pnand %p1606_p6, %p198_p12  ;;  %s2062_s27 = smov [#allocation2]  }
  0x38   : > { %s210_s28 = sshll.u32 %s2062_s27, 4  ;;  %s1694_s29 = sshll.u32 %s2052_s22, 12  ;;  %s2231_s28 = int_to_ptr.vmem [resolvable:$true] %s210_s28 }
  0x39   : > { %s2779_s26 = scalar_select %p2227_p13, 1, 0 }
  0x3a   : > { %p1706_p1 = pneg %p2227_p13  ;;  %s2780_s4 = sld [smem:[#allocation14_spill]] }
  0x3b   : > { %s270_s9 = scalar_lea.vmem [#allocation7], %s2152_s6 }
  0x3c   : > { %s279_s11 = sshll.u32 %s270_s9, 4  ;;  %p2244_p0 = pnand %p1706_p1, %p2765_p11  ;;  %s2248_s11 = int_to_ptr.vmem [resolvable:$true] %s279_s11 }
  0x40   : > { %s2239_s17 = scalar_lea.hbm %s2780_s4, %s1694_s29  ;;  %s1917_s8 = scalar_lea.hbm %s2780_s4, 8192 }
  0x41   : > { %s1912_s27 = scalar_lea.hbm %s2239_s17, 4096  ;;  %p1918_p6 = scmp.lt.u32.totalorder %s2239_s17, %s2780_s4 }
  0x42   : > { %p1913_p4 = scmp.ne.s32.totalorder %s2239_s17, %s1912_s27  ;;  %p1919_p12 = scmp.lt.u32.totalorder %s1917_s8, %s1912_s27 }
  0x43   : > { %p1921_p11 = scmp.lt.u32.totalorder %s1912_s27, %s2239_s17 }
  0x44   : > { %p1915_p2 = pnand %p1913_p4, %p1884_p9  ;;  %p1920_p1 = por %p1919_p12, %p1918_p6 }
  0x46   : > { %p1916_p3 = pneg %p1915_p2  ;;  %p1922_p10 = por %p1921_p11, %p1920_p1 }
  0x48   : > { %p1923_p8 = pnand %p1922_p10, %p1916_p3 }
  0x4a   : > { %1926 = shalt.err (!%p1923_p8)
}
  0x4b   : > { %s1927_s9 = scalar_lea.vmem %s2248_s11, 4096  ;;  %s2063_s29 = smov [#allocation7]  }
  0x4c   : > { %p1928_p4 = scmp.ne.s32.totalorder %s2248_s11, %s1927_s9  ;;  %s1932_s7 = sshll.u32 %s2063_s29, 4  ;;  %s1933_s7 = int_to_ptr.vmem [resolvable:$false] %s1932_s7 }
  0x4d   : > { %s1934_s1 = scalar_lea.vmem %s1933_s7, 8192  ;;  %p1935_p13 = scmp.lt.s32.totalorder %s2248_s11, %s1933_s7 }
  0x4e   : > { %p1930_p2 = pnand %p1928_p4, %p1884_p9  ;;  %p1936_p6 = scmp.lt.s32.totalorder %s1934_s1, %s1927_s9 }
  0x50   : > { %p1931_p5 = pneg %p1930_p2  ;;  %p1937_p12 = por %p1936_p6, %p1935_p13 }
  0x52   : > { %p1938_p11 = pnand %p1937_p12, %p1931_p5 }
  0x54   : > { %1941 = shalt.err (!%p1938_p11)
}
  0x55   : > { %s2782_s27 = smov 8   ;;  %s2783_s8 = smov 128  }
  0x56   : > { %1716 = dma.hbm_to_vmem [thread:$0]  (!%p2163_p7), %s2239_s17, 4096, %s2248_s11, %s2169_s14, %s2783_s8, %s2783_s8, %s2782_s27  }
  0x57   : > { %s1942_s29 = scalar_lea.hbm %s2756_s0, 4096  ;;  %p1944_p5 = pneg %p2244_p0 }
  0x58   : > { %p1943_p9 = scmp.ne.s32.totalorder %s2756_s0, %s1942_s29  ;;  %p1949_p13 = scmp.lt.u32.totalorder %s1942_s29, %s2756_s0 }
  0x5a   : > { %p1945_p8 = pnand %p1944_p5, %p1943_p9 }
  0x5c   : > { %p1946_p10 = pneg %p1945_p8 }
  0x5e   : > { %p1951_p3 = pnand %p1949_p13, %p1946_p10 }
  0x60   : > { %1954 = shalt.err (!%p1951_p3)
}
  0x61   : > { %s1955_s14 = scalar_lea.vmem %s2231_s28, 4096  ;;  %p1963_p2 = scmp.lt.s32.totalorder %s2231_s28, %s2231_s28 }
  0x62   : > { %p1956_p7 = scmp.ne.s32.totalorder %s2231_s28, %s1955_s14  ;;  %p1964_p6 = scmp.lt.s32.totalorder %s1955_s14, %s1955_s14 }
  0x64   : > { %p1958_p1 = pnand %p1956_p7, %p1944_p5  ;;  %p1965_p12 = por %p1964_p6, %p1963_p2 }
  0x66   : > { %p1959_p4 = pneg %p1958_p1 }
  0x68   : > { %p1966_p11 = pnand %p1965_p12, %p1959_p4 }
  0x6a   : > { %1969 = shalt.err (!%p1966_p11)
}
  0x6b   : > { %s2064_s4 = smov 16   ;;  %s2784_s24 = smov 256  }
  0x6c   : > { %1709 = dma.hbm_to_vmem [thread:$0]  (!%p2244_p0), %s2756_s0, 4096, %s2231_s28, [#allocation3], %s2784_s24, %s2784_s24, %s2064_s4  }
  0x6d   : > { %p2785_p9 = scmp.ne.s32.totalorder %s2779_s26, 0 }
  0x6e   : > { %p2786_p5 = scmp.eq.s32.totalorder (!%p2785_p9), %s2201_s16, 0 }
  0x6f   : > { %291 = sbr.rel (%p2785_p9) target bundleno = 802 (0x322), region = 40 }
  0x76   : > { %2023 = dma.done.wait (%p2786_p5), [#allocation3], 4096   ;;  %p2787_p8 = pmov %p2786_p5 }
  0x77   : > { %s297_s15 = sand.u32 1, %s2201_s16   ;;  %s299_s1 = sand.u32 1, %s2040_s19  }
  0x78   : > { %2025 = vsyncadd (%p2787_p8), [#allocation3], 4294963200  ;;  %s2310_s27 = sshll.u32 %s299_s1, 8  ;;  %s298_s28 = scalar_lea.sflag [#allocation6], %s297_s15 }
  0x79   : > { %s2313_s8 = scalar_lea.vmem [#allocation5], %s2310_s27  ;;  %p2788_p0 = scmp.ne.s32.totalorder %s2776_s25, 0 }
  0x7b   : > { %2027 = dma.done.wait (%p2788_p0), %s298_s28, 8192  }
  0x7c   : > { %2029 = vsyncadd (%p2788_p0), %s298_s28, 4294959104  ;;  %v1782_v0 = vld [vmem:[%s2313_s8 + $0x4] ss:$8 sps:$4 sm:$0xff]   ;;  %v1784_v1 = vld [vmem:[%s2313_s8] ss:$8 sps:$4 sm:$0xff]   ;;  %s2352_s16 = scalar_lea.vmem [#allocation7], %s2310_s27 }
  0x7d   : > { %646 = vmatprep.subr.bf16.mxu0 %v1782_v0  ;;  %v1785_v2 = vld [vmem:[%s2313_s8 + $0x14] ss:$8 sps:$4 sm:$0xff]   ;;  %v1787_v3 = vld [vmem:[%s2313_s8 + $0x10] ss:$8 sps:$4 sm:$0xff]   ;;  %v1788_v4 = vld [vmem:[%s2313_s8 + $0x24] ss:$8 sps:$4 sm:$0xff]  }
  0x7e   : > { %647 = vmatpush1.bf16.msra.mxu0 %v1784_v1  ;;  %v1790_v5 = vld [vmem:[%s2313_s8 + $0x20] ss:$8 sps:$4 sm:$0xff]   ;;  %v1791_v6 = vld [vmem:[%s2313_s8 + $0x34] ss:$8 sps:$4 sm:$0xff]   ;;  %v1793_v7 = vld [vmem:[%s2313_s8 + $0x30] ss:$8 sps:$4 sm:$0xff]  }
  0x7f   : > { %648 = vmatprep.subr.bf16.mxu0 %v1785_v2  ;;  %v1794_v8 = vld [vmem:[%s2313_s8 + $0x44] ss:$8 sps:$4 sm:$0xff]   ;;  %v1796_v9 = vld [vmem:[%s2313_s8 + $0x40] ss:$8 sps:$4 sm:$0xff]   ;;  %v1797_v10 = vld [vmem:[%s2313_s8 + $0x54] ss:$8 sps:$4 sm:$0xff]  }
  0x80   : > { %v1799_v11 = vld [vmem:[%s2313_s8 + $0x50] ss:$8 sps:$4 sm:$0xff]   ;;  %v1800_v12 = vld [vmem:[%s2313_s8 + $0x64] ss:$8 sps:$4 sm:$0xff]   ;;  %v1802_v16 = vld [vmem:[%s2313_s8 + $0x60] ss:$8 sps:$4 sm:$0xff]  }
  0x81   : > { %v407_v13 = vld [vmem:[#allocation2 + $0x8] sm:$0xff]  ;;  %v409_v14 = vld [vmem:[#allocation2 + $0x18] sm:$0xff]  ;;  %v406_v35 = vld [vmem:[#allocation2] sm:$0xff]  ;;  %s1621_s25 = sshll.u32 %s2048_s21, 1  ;;  %s2664_s14 = scalar_lea.vmem [#allocation8], %s2310_s27 }
  0x82   : > { %649 = vmatpush1.bf16.msra.mxu0 %v1787_v3  ;;  %v439_v15 = vpack.c.bf16 %v409_v14, %v407_v13  ;;  %v1803_v17 = vld [vmem:[%s2313_s8 + $0x74] ss:$8 sps:$4 sm:$0xff]   ;;  %v1805_v18 = vld [vmem:[%s2313_s8 + $0x70] ss:$8 sps:$4 sm:$0xff]   ;;  %v1806_v19 = vld [vmem:[%s2313_s8 + $0x84] ss:$8 sps:$4 sm:$0xff]  }
  0x83   : > { %650 = vmatprep.subr.bf16.mxu0 %v1788_v4  ;;  %v1808_v20 = vld [vmem:[%s2313_s8 + $0x80] ss:$8 sps:$4 sm:$0xff]   ;;  %v1809_v21 = vld [vmem:[%s2313_s8 + $0x94] ss:$8 sps:$4 sm:$0xff]   ;;  %v1811_v22 = vld [vmem:[%s2313_s8 + $0x90] ss:$8 sps:$4 sm:$0xff]  }
  0x84   : > { %678 = vmatprep.mubr.bf16.mxu0 %v439_v15  ;;  %v1812_v23 = vld [vmem:[%s2313_s8 + $0xa4] ss:$8 sps:$4 sm:$0xff]   ;;  %v1814_v24 = vld [vmem:[%s2313_s8 + $0xa0] ss:$8 sps:$4 sm:$0xff]   ;;  %v1815_v25 = vld [vmem:[%s2313_s8 + $0xb4] ss:$8 sps:$4 sm:$0xff]  }
  0x85   : > { %v1817_v26 = vld [vmem:[%s2313_s8 + $0xb0] ss:$8 sps:$4 sm:$0xff]   ;;  %v1818_v27 = vld [vmem:[%s2313_s8 + $0xc4] ss:$8 sps:$4 sm:$0xff]   ;;  %v1820_v28 = vld [vmem:[%s2313_s8 + $0xc0] ss:$8 sps:$4 sm:$0xff]  }
  0x86   : > { %651 = vmatpush1.bf16.msra.mxu0 %v1790_v5  ;;  %v1821_v29 = vld [vmem:[%s2313_s8 + $0xd4] ss:$8 sps:$4 sm:$0xff]   ;;  %v1823_v30 = vld [vmem:[%s2313_s8 + $0xd0] ss:$8 sps:$4 sm:$0xff]   ;;  %v1824_v31 = vld [vmem:[%s2313_s8 + $0xe4] ss:$8 sps:$4 sm:$0xff]  }
  0x87   : > { %652 = vmatprep.subr.bf16.mxu0 %v1791_v6  ;;  %v1826_v32 = vld [vmem:[%s2313_s8 + $0xe0] ss:$8 sps:$4 sm:$0xff]   ;;  %v1827_v33 = vld [vmem:[%s2313_s8 + $0xf4] ss:$8 sps:$4 sm:$0xff]   ;;  %v1829_v34 = vld [vmem:[%s2313_s8 + $0xf0] ss:$8 sps:$4 sm:$0xff]  }
  0x88   : > { %v408_v36 = vld [vmem:[#allocation2 + $0x10] sm:$0xff]  ;;  %v411_v37 = vld [vmem:[#allocation2 + $0x28] sm:$0xff]  ;;  %v413_v38 = vld [vmem:[#allocation2 + $0x38] sm:$0xff]  ;;  %p356_p10 = scmp.lt.s32.totalorder %s1621_s25, 3  ;;  %s1695_s4 = sshll.u32 %s2048_s21, 12 }
  0x89   : > { %v438_v39 = vpack.c.bf16 %v408_v36, %v406_v35  ;;  %v441_v40 = vpack.c.bf16 %v413_v38, %v411_v37  ;;  %v410_v41 = vld [vmem:[#allocation2 + $0x20] sm:$0xff]  ;;  %v412_v42 = vld [vmem:[#allocation2 + $0x30] sm:$0xff]  ;;  %v415_v43 = vld [vmem:[#allocation2 + $0x48] sm:$0xff]  ;;  %s1471_s24 = sshll.u32 %s2664_s14, 4  ;;  %s2700_s15 = scalar_lea.hbm %s2761_s5, %s1695_s4  ;;  %s2702_s24 = int_to_ptr.vmem [resolvable:$true] %s1471_s24 }
  0x8a   : > { %653 = vmatpush1.bf16.msra.mxu0 %v1793_v7  ;;  %v417_v44 = vld [vmem:[#allocation2 + $0x58] sm:$0xff]  ;;  %v440_v45 = vpack.c.bf16 %v412_v42, %v410_v41  ;;  %v414_v47 = vld [vmem:[#allocation2 + $0x40] sm:$0xff]  ;;  %v416_v48 = vld [vmem:[#allocation2 + $0x50] sm:$0xff]  ;;  %s2801_s25 = smov (!%p356_p10, %s1621_s25), 3  ;;  %s2709_s21 = scalar_lea.sflag [#allocation4], %s299_s1 }
  0x8b   : > { %654 = vmatprep.subr.bf16.mxu0 %v1794_v8  ;;  %v443_v46 = vpack.c.bf16 %v417_v44, %v415_v43  ;;  %v419_v49 = vld [vmem:[#allocation2 + $0x68] sm:$0xff]  ;;  %v421_v50 = vld [vmem:[#allocation2 + $0x78] sm:$0xff]  ;;  %v442_v51 = vpack.c.bf16 %v416_v48, %v414_v47  ;;  %v418_v53 = vld [vmem:[#allocation2 + $0x60] sm:$0xff]  ;;  %s358_s29 = scalar_lea.vmem %s2758_s2, %s2801_s25  ;;  %s365_s9 = scalar_lea.vmem %s2759_s3, %s2801_s25 }
  0x8c   : > { %v445_v52 = vpack.c.bf16 %v421_v50, %v419_v49  ;;  %v420_v54 = vld [vmem:[#allocation2 + $0x70] sm:$0xff]  ;;  %v423_v55 = vld [vmem:[#allocation2 + $0x88] sm:$0xff]  ;;  %v425_v56 = vld [vmem:[#allocation2 + $0x98] sm:$0xff]  ;;  %s1970_s27 = scalar_lea.vmem %s2702_s24, 4096  ;;  %p2789_p3 = scmp.ne.s32.totalorder %s2777_s10, 0 }
  0x8d   : > { %v444_v57 = vpack.c.bf16 %v420_v54, %v418_v53  ;;  %v447_v58 = vpack.c.bf16 %v425_v56, %v423_v55  ;;  %v422_v59 = vld [vmem:[#allocation2 + $0x80] sm:$0xff]  ;;  %v424_v60 = vld [vmem:[#allocation2 + $0x90] sm:$0xff]  ;;  %v427_v61 = vld [vmem:[#allocation2 + $0xa8] sm:$0xff]  ;;  %p1971_p13 = scmp.ne.s32.totalorder %s2702_s24, %s1970_s27  ;;  %s2066_s28 = smov [#allocation8]  }
  0x8e   : > { %655 = vmatpush1.bf16.msra.mxu0 %v1796_v9  ;;  %v429_v62 = vld [vmem:[#allocation2 + $0xb8] sm:$0xff]  ;;  %v446_v63 = vpack.c.bf16 %v424_v60, %v422_v59  ;;  %v426_v1 = vld [vmem:[#allocation2 + $0xa0] sm:$0xff]  ;;  %v428_v2 = vld [vmem:[#allocation2 + $0xb0] sm:$0xff]  ;;  %s1974_s8 = sshll.u32 %s2066_s28, 4  ;;  %s1975_s8 = int_to_ptr.vmem [resolvable:$false] %s1974_s8 }
  0x8f   : > { %656 = vmatprep.subr.bf16.mxu0 %v1797_v10  ;;  %v449_v0 = vpack.c.bf16 %v429_v62, %v427_v61  ;;  %v431_v3 = vld [vmem:[#allocation2 + $0xc8] sm:$0xff]  ;;  %v433_v4 = vld [vmem:[#allocation2 + $0xd8] sm:$0xff]  ;;  %v448_v5 = vpack.c.bf16 %v428_v2, %v426_v1  ;;  %v430_v7 = vld [vmem:[#allocation2 + $0xc0] sm:$0xff]  ;;  %p1972_p7 = pnand %p1971_p13, %p2789_p3  ;;  %p1977_p4 = scmp.lt.s32.totalorder %s2702_s24, %s1975_s8 }
  0x90   : > { %v451_v6 = vpack.c.bf16 %v433_v4, %v431_v3  ;;  %v432_v8 = vld [vmem:[#allocation2 + $0xd0] sm:$0xff]  ;;  %v435_v9 = vld [vmem:[#allocation2 + $0xe8] sm:$0xff]  ;;  %v437_v10 = vld [vmem:[#allocation2 + $0xf8] sm:$0xff] }
  0x91   : > { %v434_v13 = vld [vmem:[#allocation2 + $0xe0] sm:$0xff]  ;;  %v436_v14 = vld [vmem:[#allocation2 + $0xf0] sm:$0xff]  ;;  %p1973_p1 = pneg %p1972_p7 }
  0x92   : > { %657 = vmatpush1.bf16.msra.mxu0 %v1799_v11  ;;  %v450_v11 = vpack.c.bf16 %v432_v8, %v430_v7  ;;  %v452_v15 = vpack.c.bf16 %v436_v14, %v434_v13  ;;  %v1859_v35 = vld [vmem:[%s2352_s16 + $0x90] ss:$8 sps:$4 sm:$0xff]   ;;  %v1860_v36 = vld [vmem:[%s2352_s16 + $0xa4] ss:$8 sps:$4 sm:$0xff]   ;;  %v1862_v37 = vld [vmem:[%s2352_s16 + $0xa0] ss:$8 sps:$4 sm:$0xff]  }
  0x93   : > { %658 = vmatprep.subr.bf16.mxu0 %v1800_v12  ;;  %v453_v12 = vpack.c.bf16 %v437_v10, %v435_v9  ;;  %v1863_v38 = vld [vmem:[%s2352_s16 + $0xb4] ss:$8 sps:$4 sm:$0xff]   ;;  %v1868_v41 = vld [vmem:[%s2352_s16 + $0xc0] ss:$8 sps:$4 sm:$0xff]   ;;  %v1871_v43 = vld [vmem:[%s2352_s16 + $0xd0] ss:$8 sps:$4 sm:$0xff]  }
  0x94   : > { %v1869_v42 = vld [vmem:[%s2352_s16 + $0xd4] ss:$8 sps:$4 sm:$0xff]   ;;  %v1872_v44 = vld [vmem:[%s2352_s16 + $0xe4] ss:$8 sps:$4 sm:$0xff]   ;;  %v1877_v47 = vld [vmem:[%s2352_s16 + $0xf0] ss:$8 sps:$4 sm:$0xff]  }
  0x96   : > { %659 = vmatpush1.bf16.msra.mxu0 %v1802_v16  ;;  %v1830_v16 = vld [vmem:[%s2352_s16 + $0x4] ss:$8 sps:$4 sm:$0xff]  }
  0x97   : > { %660 = vmatprep.subr.bf16.mxu0 %v1803_v17  ;;  %v1832_v17 = vld [vmem:[%s2352_s16] ss:$8 sps:$4 sm:$0xff]   ;;  %1280 = vmatprep.subr.bf16.mxu1 %v1830_v16 }
  0x98   : > { %1281 = vmatpush1.bf16.msra.mxu1 %v1832_v17 }
  0x9a   : > { %661 = vmatpush1.bf16.msra.mxu0 %v1805_v18  ;;  %v1833_v18 = vld [vmem:[%s2352_s16 + $0x14] ss:$8 sps:$4 sm:$0xff]  }
  0x9b   : > { %662 = vmatprep.subr.bf16.mxu0 %v1806_v19  ;;  %v1835_v19 = vld [vmem:[%s2352_s16 + $0x10] ss:$8 sps:$4 sm:$0xff]   ;;  %1282 = vmatprep.subr.bf16.mxu1 %v1833_v18 }
  0x9c   : > { %1283 = vmatpush1.bf16.msra.mxu1 %v1835_v19 }
  0x9e   : > { %663 = vmatpush1.bf16.msra.mxu0 %v1808_v20  ;;  %v1836_v20 = vld [vmem:[%s2352_s16 + $0x24] ss:$8 sps:$4 sm:$0xff]  }
  0x9f   : > { %664 = vmatprep.subr.bf16.mxu0 %v1809_v21  ;;  %v1838_v21 = vld [vmem:[%s2352_s16 + $0x20] ss:$8 sps:$4 sm:$0xff]   ;;  %1284 = vmatprep.subr.bf16.mxu1 %v1836_v20 }
  0xa0   : > { %1285 = vmatpush1.bf16.msra.mxu1 %v1838_v21 }
  0xa2   : > { %665 = vmatpush1.bf16.msra.mxu0 %v1811_v22  ;;  %v1839_v22 = vld [vmem:[%s2352_s16 + $0x34] ss:$8 sps:$4 sm:$0xff]  }
  0xa3   : > { %666 = vmatprep.subr.bf16.mxu0 %v1812_v23  ;;  %v1841_v23 = vld [vmem:[%s2352_s16 + $0x30] ss:$8 sps:$4 sm:$0xff]   ;;  %1286 = vmatprep.subr.bf16.mxu1 %v1839_v22 }
  0xa4   : > { %1287 = vmatpush1.bf16.msra.mxu1 %v1841_v23 }
  0xa6   : > { %667 = vmatpush1.bf16.msra.mxu0 %v1814_v24  ;;  %v1842_v24 = vld [vmem:[%s2352_s16 + $0x44] ss:$8 sps:$4 sm:$0xff]  }
  0xa7   : > { %668 = vmatprep.subr.bf16.mxu0 %v1815_v25  ;;  %v1844_v25 = vld [vmem:[%s2352_s16 + $0x40] ss:$8 sps:$4 sm:$0xff]   ;;  %1288 = vmatprep.subr.bf16.mxu1 %v1842_v24 }
  0xa8   : > { %1289 = vmatpush1.bf16.msra.mxu1 %v1844_v25 }
  0xaa   : > { %669 = vmatpush1.bf16.msra.mxu0 %v1817_v26  ;;  %v1845_v26 = vld [vmem:[%s2352_s16 + $0x54] ss:$8 sps:$4 sm:$0xff]  }
  0xab   : > { %670 = vmatprep.subr.bf16.mxu0 %v1818_v27  ;;  %v1847_v27 = vld [vmem:[%s2352_s16 + $0x50] ss:$8 sps:$4 sm:$0xff]   ;;  %1290 = vmatprep.subr.bf16.mxu1 %v1845_v26 }
  0xac   : > { %1291 = vmatpush1.bf16.msra.mxu1 %v1847_v27 }
  0xae   : > { %671 = vmatpush1.bf16.msra.mxu0 %v1820_v28  ;;  %v1848_v28 = vld [vmem:[%s2352_s16 + $0x64] ss:$8 sps:$4 sm:$0xff]  }
  0xaf   : > { %672 = vmatprep.subr.bf16.mxu0 %v1821_v29  ;;  %v1850_v29 = vld [vmem:[%s2352_s16 + $0x60] ss:$8 sps:$4 sm:$0xff]   ;;  %1292 = vmatprep.subr.bf16.mxu1 %v1848_v28 }
  0xb0   : > { %1293 = vmatpush1.bf16.msra.mxu1 %v1850_v29 }
  0xb2   : > { %673 = vmatpush1.bf16.msra.mxu0 %v1823_v30  ;;  %v1851_v30 = vld [vmem:[%s2352_s16 + $0x74] ss:$8 sps:$4 sm:$0xff]  }
  0xb3   : > { %674 = vmatprep.subr.bf16.mxu0 %v1824_v31  ;;  %v1853_v31 = vld [vmem:[%s2352_s16 + $0x70] ss:$8 sps:$4 sm:$0xff]   ;;  %1294 = vmatprep.subr.bf16.mxu1 %v1851_v30 }
  0xb4   : > { %1295 = vmatpush1.bf16.msra.mxu1 %v1853_v31 }
  0xb6   : > { %675 = vmatpush1.bf16.msra.mxu0 %v1826_v32  ;;  %v1854_v32 = vld [vmem:[%s2352_s16 + $0x84] ss:$8 sps:$4 sm:$0xff]  }
  0xb7   : > { %676 = vmatprep.subr.bf16.mxu0 %v1827_v33  ;;  %v1856_v33 = vld [vmem:[%s2352_s16 + $0x80] ss:$8 sps:$4 sm:$0xff]   ;;  %1296 = vmatprep.subr.bf16.mxu1 %v1854_v32 }
  0xb8   : > { %1297 = vmatpush1.bf16.msra.mxu1 %v1856_v33 }
  0xba   : > { %677 = vmatpush1.bf16.msra.mxu0 %v1829_v34  ;;  %v1857_v34 = vld [vmem:[%s2352_s16 + $0x94] ss:$8 sps:$4 sm:$0xff]  }
  0xbb   : > { %1298 = vmatprep.subr.bf16.mxu1 %v1857_v34 }
  0xbc   : > { %1299 = vmatpush1.bf16.msra.mxu1 %v1859_v35 }
  0xbd   : > { %679 = vmatmul.mubr.bf16.vlgmr.msra.gmra.mrb[0].mxu0 %v438_v39  ;;  %1300 = vmatprep.subr.bf16.mxu1 %v1860_v36  ;;  %v1865_v39 = vld [vmem:[%s2352_s16 + $0xb0] ss:$8 sps:$4 sm:$0xff]  }
  0xbe   : > { %688 = vmatprep.mubr.bf16.mxu0 %v441_v40  ;;  %v1866_v40 = vld [vmem:[%s2352_s16 + $0xc4] ss:$8 sps:$4 sm:$0xff]  }
  0xc0   : > { %1301 = vmatpush1.bf16.msra.mxu1 %v1862_v37 }
  0xc1   : > { %1302 = vmatprep.subr.bf16.mxu1 %v1863_v38 }
  0xc4   : > { %1303 = vmatpush1.bf16.msra.mxu1 %v1865_v39 }
  0xc5   : > { %689 = vmatmul.mubr.bf16.gmra.mrb[4].mxu0 %v440_v45  ;;  %1304 = vmatprep.subr.bf16.mxu1 %v1866_v40  ;;  %v1874_v45 = vld [vmem:[%s2352_s16 + $0xe0] ss:$8 sps:$4 sm:$0xff]  }
  0xc6   : > { %698 = vmatprep.mubr.bf16.mxu0 %v443_v46  ;;  %v1875_v46 = vld [vmem:[%s2352_s16 + $0xf4] ss:$8 sps:$4 sm:$0xff]   ;;  %s1976_s16 = scalar_lea.vmem %s1975_s8, 8192 }
  0xc7   : > { %p1978_p2 = scmp.lt.s32.totalorder %s1976_s16, %s1970_s27 }
  0xc8   : > { %1305 = vmatpush1.bf16.msra.mxu1 %v1868_v41 }
  0xc9   : > { %1306 = vmatprep.subr.bf16.mxu1 %v1869_v42  ;;  %p1979_p6 = por %p1978_p2, %p1977_p4 }
  0xcb   : > { %p1980_p12 = pnand %p1979_p6, %p1973_p1 }
  0xcc   : > { %1307 = vmatpush1.bf16.msra.mxu1 %v1871_v43 }
  0xcd   : > { %699 = vmatmul.mubr.bf16.gmra.mrb[8].mxu0 %v442_v51  ;;  %1308 = vmatprep.subr.bf16.mxu1 %v1872_v44 }
  0xce   : > { %708 = vmatprep.mubr.bf16.mxu0 %v445_v52 }
  0xd0   : > { %1309 = vmatpush1.bf16.msra.mxu1 %v1874_v45 }
  0xd1   : > { %1310 = vmatprep.subr.bf16.mxu1 %v1875_v46 }
  0xd4   : > { %1311 = vmatpush1.bf16.msra.mxu1 %v1877_v47 }
  0xd5   : > { %709 = vmatmul.mubr.bf16.gmra.mrb[12].mxu0 %v444_v57 }
  0xd6   : > { %718 = vmatprep.mubr.bf16.mxu0 %v447_v58 }
  0xdd   : > { %719 = vmatmul.mubr.bf16.gmra.mrb[16].mxu0 %v446_v63 }
  0xde   : > { %728 = vmatprep.mubr.bf16.mxu0 %v449_v0 }
  0xe5   : > { %729 = vmatmul.mubr.bf16.gmra.mrb[20].mxu0 %v448_v5 }
  0xe6   : > { %738 = vmatprep.mubr.bf16.mxu0 %v451_v6 }
  0xed   : > { %739 = vmatmul.mubr.bf16.gmra.mrb[24].mxu0 %v450_v11 }
  0xee   : > { %748 = vmatprep.mubr.bf16.mxu0 %v453_v12 }
  0xf5   : > { %749 = vmatmul.mubr.bf16.gmra.mrb[28].mxu0 %v452_v15 }
 0x190   : > { %v2386_v48 = vpop.f32.mrb[0].mxu0 }
 0x191   : > { %v2388_v49 = vpop.f32.mrb[1].mxu0  ;;  %v803_v51 = vmul.f32 %v2386_v48, %v2386_v48 }
 0x192   : > { %v2390_v50 = vpop.f32.mrb[2].mxu0  ;;  %v804_v55 = vmul.f32 %v2388_v49, %v2388_v49 }
 0x193   : > { %v759_v52 = vadd.f32 %v2390_v50, %v2386_v48  ;;  %v805_v53 = vmul.f32 %v2390_v50, %v2390_v50  ;;  %v2398_v54 = vpop.f32.mrb[3].mxu0 }
 0x194   : > { %v780_v56 = vadd.f32 %v2398_v54, %v2388_v49  ;;  %v806_v57 = vmul.f32 %v2398_v54, %v2398_v54 }
 0x195   : > { %v835_v58 = vadd.f32 %v805_v53, %v803_v51 }
 0x196   : > { %v856_v59 = vadd.f32 %v806_v57, %v804_v55 }
 0x198   : > { %v2406_v60 = vpop.f32.mrb[4].mxu0 }
 0x199   : > { %v760_v61 = vadd.f32 %v759_v52, %v2406_v60  ;;  %v807_v62 = vmul.f32 %v2406_v60, %v2406_v60  ;;  %v2411_v63 = vpop.f32.mrb[5].mxu0 }
 0x19a   : > { %v781_v0 = vadd.f32 %v780_v56, %v2411_v63  ;;  %v808_v1 = vmul.f32 %v2411_v63, %v2411_v63  ;;  %v2416_v2 = vpop.f32.mrb[6].mxu0 }
 0x19b   : > { %v836_v3 = vadd.f32 %v835_v58, %v807_v62  ;;  %v761_v4 = vadd.f32 %v760_v61, %v2416_v2  ;;  %v809_v5 = vmul.f32 %v2416_v2, %v2416_v2  ;;  %v2421_v6 = vpop.f32.mrb[7].mxu0 }
 0x19c   : > { %v857_v7 = vadd.f32 %v856_v59, %v808_v1  ;;  %v782_v8 = vadd.f32 %v781_v0, %v2421_v6  ;;  %v810_v9 = vmul.f32 %v2421_v6, %v2421_v6 }
 0x19d   : > { %v837_v10 = vadd.f32 %v836_v3, %v809_v5 }
 0x19e   : > { %v858_v11 = vadd.f32 %v857_v7, %v810_v9 }
 0x1a0   : > { %v2426_v12 = vpop.f32.mrb[8].mxu0 }
 0x1a1   : > { %v762_v13 = vadd.f32 %v761_v4, %v2426_v12  ;;  %v811_v14 = vmul.f32 %v2426_v12, %v2426_v12  ;;  %v2431_v15 = vpop.f32.mrb[9].mxu0 }
 0x1a2   : > { %v783_v16 = vadd.f32 %v782_v8, %v2431_v15  ;;  %v812_v17 = vmul.f32 %v2431_v15, %v2431_v15  ;;  %v2436_v18 = vpop.f32.mrb[10].mxu0 }
 0x1a3   : > { %v838_v19 = vadd.f32 %v837_v10, %v811_v14  ;;  %v763_v20 = vadd.f32 %v762_v13, %v2436_v18  ;;  %v813_v21 = vmul.f32 %v2436_v18, %v2436_v18  ;;  %v2441_v22 = vpop.f32.mrb[11].mxu0 }
 0x1a4   : > { %v859_v23 = vadd.f32 %v858_v11, %v812_v17  ;;  %v784_v24 = vadd.f32 %v783_v16, %v2441_v22  ;;  %v814_v25 = vmul.f32 %v2441_v22, %v2441_v22 }
 0x1a5   : > { %v839_v26 = vadd.f32 %v838_v19, %v813_v21 }
 0x1a6   : > { %v860_v27 = vadd.f32 %v859_v23, %v814_v25 }
 0x1a8   : > { %v2446_v28 = vpop.f32.mrb[12].mxu0 }
 0x1a9   : > { %v764_v29 = vadd.f32 %v763_v20, %v2446_v28  ;;  %v815_v30 = vmul.f32 %v2446_v28, %v2446_v28  ;;  %v2451_v31 = vpop.f32.mrb[13].mxu0 }
 0x1aa   : > { %v785_v32 = vadd.f32 %v784_v24, %v2451_v31  ;;  %v816_v33 = vmul.f32 %v2451_v31, %v2451_v31  ;;  %v2456_v34 = vpop.f32.mrb[14].mxu0 }
 0x1ab   : > { %v840_v35 = vadd.f32 %v839_v26, %v815_v30  ;;  %v765_v36 = vadd.f32 %v764_v29, %v2456_v34  ;;  %v817_v37 = vmul.f32 %v2456_v34, %v2456_v34  ;;  %v2461_v38 = vpop.f32.mrb[15].mxu0 }
 0x1ac   : > { %v861_v39 = vadd.f32 %v860_v27, %v816_v33  ;;  %v786_v40 = vadd.f32 %v785_v32, %v2461_v38  ;;  %v818_v41 = vmul.f32 %v2461_v38, %v2461_v38 }
 0x1ad   : > { %v841_v42 = vadd.f32 %v840_v35, %v817_v37 }
 0x1ae   : > { %v862_v43 = vadd.f32 %v861_v39, %v818_v41 }
 0x1b0   : > { %v2466_v44 = vpop.f32.mrb[16].mxu0 }
 0x1b1   : > { %v766_v45 = vadd.f32 %v765_v36, %v2466_v44  ;;  %v819_v46 = vmul.f32 %v2466_v44, %v2466_v44  ;;  %v2471_v47 = vpop.f32.mrb[17].mxu0 }
 0x1b2   : > { %v787_v51 = vadd.f32 %v786_v40, %v2471_v47  ;;  %v820_v52 = vmul.f32 %v2471_v47, %v2471_v47  ;;  %v2476_v53 = vpop.f32.mrb[18].mxu0 }
 0x1b3   : > { %v842_v55 = vadd.f32 %v841_v42, %v819_v46  ;;  %v767_v56 = vadd.f32 %v766_v45, %v2476_v53  ;;  %v821_v57 = vmul.f32 %v2476_v53, %v2476_v53  ;;  %v2481_v58 = vpop.f32.mrb[19].mxu0 }
 0x1b4   : > { %v863_v59 = vadd.f32 %v862_v43, %v820_v52  ;;  %v788_v61 = vadd.f32 %v787_v51, %v2481_v58  ;;  %v822_v62 = vmul.f32 %v2481_v58, %v2481_v58 }
 0x1b5   : > { %v843_v0 = vadd.f32 %v842_v55, %v821_v57 }
 0x1b6   : > { %v864_v1 = vadd.f32 %v863_v59, %v822_v62 }
 0x1b8   : > { %v2486_v3 = vpop.f32.mrb[20].mxu0 }
 0x1b9   : > { %v768_v4 = vadd.f32 %v767_v56, %v2486_v3  ;;  %v823_v5 = vmul.f32 %v2486_v3, %v2486_v3  ;;  %v2491_v7 = vpop.f32.mrb[21].mxu0 }
 0x1ba   : > { %v789_v8 = vadd.f32 %v788_v61, %v2491_v7  ;;  %v824_v9 = vmul.f32 %v2491_v7, %v2491_v7  ;;  %v2496_v10 = vpop.f32.mrb[22].mxu0 }
 0x1bb   : > { %v844_v11 = vadd.f32 %v843_v0, %v823_v5  ;;  %v769_v13 = vadd.f32 %v768_v4, %v2496_v10  ;;  %v825_v14 = vmul.f32 %v2496_v10, %v2496_v10  ;;  %v2501_v16 = vpop.f32.mrb[23].mxu0 }
 0x1bc   : > { %v865_v17 = vadd.f32 %v864_v1, %v824_v9  ;;  %v790_v19 = vadd.f32 %v789_v8, %v2501_v16  ;;  %v826_v20 = vmul.f32 %v2501_v16, %v2501_v16 }
 0x1bd   : > { %v845_v21 = vadd.f32 %v844_v11, %v825_v14 }
 0x1be   : > { %v866_v23 = vadd.f32 %v865_v17, %v826_v20 }
 0x1c0   : > { %v2506_v24 = vpop.f32.mrb[24].mxu0 }
 0x1c1   : > { %v770_v25 = vadd.f32 %v769_v13, %v2506_v24  ;;  %v827_v26 = vmul.f32 %v2506_v24, %v2506_v24  ;;  %v2511_v27 = vpop.f32.mrb[25].mxu0 }
 0x1c2   : > { %v791_v29 = vadd.f32 %v790_v19, %v2511_v27  ;;  %v828_v30 = vmul.f32 %v2511_v27, %v2511_v27  ;;  %v2516_v32 = vpop.f32.mrb[26].mxu0 }
 0x1c3   : > { %v846_v33 = vadd.f32 %v845_v21, %v827_v26  ;;  %v771_v35 = vadd.f32 %v770_v25, %v2516_v32  ;;  %v829_v36 = vmul.f32 %v2516_v32, %v2516_v32  ;;  %v2521_v37 = vpop.f32.mrb[27].mxu0 }
 0x1c4   : > { %v867_v39 = vadd.f32 %v866_v23, %v828_v30  ;;  %v792_v40 = vadd.f32 %v791_v29, %v2521_v37  ;;  %v830_v41 = vmul.f32 %v2521_v37, %v2521_v37 }
 0x1c5   : > { %v847_v42 = vadd.f32 %v846_v33, %v829_v36 }
 0x1c6   : > { %v868_v43 = vadd.f32 %v867_v39, %v830_v41 }
 0x1c8   : > { %v2526_v45 = vpop.f32.mrb[28].mxu0 }
 0x1c9   : > { %v772_v46 = vadd.f32 %v771_v35, %v2526_v45  ;;  %v831_v51 = vmul.f32 %v2526_v45, %v2526_v45  ;;  %v2531_v52 = vpop.f32.mrb[29].mxu0 }
 0x1ca   : > { %v793_v55 = vadd.f32 %v792_v40, %v2531_v52  ;;  %v832_v56 = vmul.f32 %v2531_v52, %v2531_v52  ;;  %v2536_v57 = vpop.f32.mrb[30].mxu0 }
 0x1cb   : > { %v848_v59 = vadd.f32 %v847_v42, %v831_v51  ;;  %v773_v61 = vadd.f32 %v772_v46, %v2536_v57  ;;  %v833_v62 = vmul.f32 %v2536_v57, %v2536_v57  ;;  %v2541_v0 = vpop.f32.mrb[31].mxu0 }
 0x1cc   : > { %v869_v1 = vadd.f32 %v868_v43, %v832_v56  ;;  %v794_v4 = vadd.f32 %v793_v55, %v2541_v0  ;;  %v834_v5 = vmul.f32 %v2541_v0, %v2541_v0 }
 0x1cd   : > { %v774_v8 = vrot.slane %v773_v61, 4  ;;  %v849_v9 = vadd.f32 %v848_v59, %v833_v62 }
 0x1ce   : > { %v795_v11 = vrot.slane %v794_v4, 4  ;;  %v870_v13 = vadd.f32 %v869_v1, %v834_v5 }
 0x1cf   : > { %v775_v14 = vadd.f32 %v774_v8, %v773_v61  ;;  %v850_v17 = vrot.slane %v849_v9, 4 }
 0x1d0   : > { %v796_v19 = vadd.f32 %v795_v11, %v794_v4  ;;  %v871_v20 = vrot.slane %v870_v13, 4 }
 0x1d1   : > { %v776_v21 = vrot.slane %v775_v14, 2  ;;  %v851_v23 = vadd.f32 %v850_v17, %v849_v9  ;;  %v891_v9 = vlaneseq }
 0x1d2   : > { %v797_v25 = vrot.slane %v796_v19, 2  ;;  %v872_v26 = vadd.f32 %v871_v20, %v870_v13 }
 0x1d3   : > { %v777_v29 = vadd.f32 %v776_v21, %v775_v14  ;;  %v852_v30 = vrot.slane %v851_v23, 2 }
 0x1d4   : > { %v798_v33 = vadd.f32 %v797_v25, %v796_v19  ;;  %v873_v35 = vrot.slane %v872_v26, 2  ;;  %v892_v19 = vshrl.u32 %v891_v9, 7 }
 0x1d5   : > { %v778_v36 = vrot.slane %v777_v29, 1  ;;  %v853_v39 = vadd.f32 %v852_v30, %v851_v23  ;;  %v889_v23 = vld [vmem:[%s358_s29] sm:$0x3] }
 0x1d6   : > { %v799_v40 = vrot.slane %v798_v33, 1  ;;  %v874_v41 = vadd.f32 %v873_v35, %v872_v26  ;;  %v893_v21 = vsub.s32 0, %v892_v19  ;;  %v897_v25 = vsub.s32 1, %v892_v19 }
 0x1d7   : > { %v779_v42 = vadd.f32 %v778_v36, %v777_v29  ;;  %v854_v43 = vrot.slane %v853_v39, 1  ;;  %v2065_v26 = vmov 1966171168  }
 0x1d8   : > { %v800_v46 = vadd.f32 %v799_v40, %v798_v33  ;;  %v875_v51 = vrot.slane %v874_v41, 1  ;;  %v910_v29 = vunpack.c.l.s4 %v2065_v26  ;;  %v894_v30 = vrot.slane %v889_v23, %v893_v21 }
 0x1d9   : > { %v801_v55 = vmul.f32 0.0078125, %v779_v42  ;;  %v855_v56 = vadd.f32 %v854_v43, %v853_v39  ;;  %v898_v33 = vrot.slane %v889_v23, %v897_v25 }
 0x1da   : > { %v802_v59 = vmul.f32 0.0078125, %v800_v46  ;;  %v876_v61 = vadd.f32 %v875_v51, %v874_v41  ;;  %v911_v36 = vunpack.c.0.s8 %v910_v29 }
 0x1db   : > { %v877_v62 = vmul.f32 0.0078125, %v855_v56  ;;  %v879_v1 = vmul.f32 %v801_v55, %v801_v55 }
 0x1dc   : > { %v878_v4 = vmul.f32 0.0078125, %v876_v61  ;;  %v880_v5 = vmul.f32 %v802_v59, %v802_v59  ;;  %v914_v51 = vsub.s32 %v911_v36, %v892_v19 }
 0x1dd   : > { %v881_v8 = vsub.f32 %v877_v62, %v879_v1 }
 0x1de   : > { %v882_v11 = vsub.f32 %v878_v4, %v880_v5 }
 0x1df   : > { %v883_v13 = vmax.f32 %v881_v8, 0.0 }
 0x1e0   : > { %v884_v14 = vmax.f32 %v882_v11, 0.0 }
 0x1e1   : > { %v885_v17 = vadd.f32 1e-05, %v883_v13 }
 0x1e2   : > { %v886_v20 = vadd.f32 1e-05, %v884_v14 }
 0x1e3   : > { %1878 = vrsqrt.f32 %v885_v17 }
 0x1e4   : > { %1880 = vrsqrt.f32 %v886_v20 }
 0x1ed   : > { %v1879_v35 = vpop.eup %1878 }
 0x1ee   : > { %v1881_v39 = vpop.eup %1880  ;;  %v901_v40 = vmul.f32 %v1879_v35, %v894_v30 }
 0x1ef   : > { %v902_v41 = vmul.f32 %v1881_v39, %v898_v33 }
 0x1f0   : > { %v904_v42 = vmul.f32 %v901_v40, %v801_v55  ;;  %v928_v43 = vrot.slane %v901_v40, %v893_v21 }
 0x1f1   : > { %v905_v46 = vmul.f32 %v902_v41, %v802_v59  ;;  %v932_v56 = vrot.slane %v902_v41, %v893_v21 }
 0x1f2   : > { %v2554_v61 = vmul.f32 %v928_v43, %v2536_v57  ;;  %v933_v62 = vmul.f32 %v928_v43, %v2386_v48  ;;  %v935_v1 = vmul.f32 %v928_v43, %v2390_v50  ;;  %v937_v4 = vmul.f32 %v928_v43, %v2406_v60 }
 0x1f3   : > { %v908_v5 = vcombine.low %v904_v42, %v905_v46  ;;  %v964_v55 = vmul.f32 %v932_v56, %v2541_v0  ;;  %v934_v59 = vmul.f32 %v932_v56, %v2388_v49  ;;  %v936_v8 = vmul.f32 %v932_v56, %v2398_v54  ;;  %v903_v0 = vld [vmem:[%s365_s9] sm:$0x3] }
 0x1f4   : > { %v938_v57 = vmul.f32 %v932_v56, %v2411_v63  ;;  %v940_v9 = vmul.f32 %v932_v56, %v2421_v6  ;;  %v939_v48 = vmul.f32 %v928_v43, %v2416_v2  ;;  %v942_v50 = vmul.f32 %v932_v56, %v2431_v15 }
 0x1f5   : > { %v915_v60 = vrot.slane %v908_v5, %v914_v51  ;;  %v944_v11 = vmul.f32 %v932_v56, %v2441_v22  ;;  %v941_v13 = vmul.f32 %v928_v43, %v2426_v12  ;;  %v943_v14 = vmul.f32 %v928_v43, %v2436_v18 }
 0x1f6   : > { %v946_v49 = vmul.f32 %v932_v56, %v2451_v31  ;;  %v948_v54 = vmul.f32 %v932_v56, %v2461_v38  ;;  %v945_v63 = vmul.f32 %v928_v43, %v2446_v28  ;;  %v947_v6 = vmul.f32 %v928_v43, %v2456_v34 }
 0x1f7   : > { %v922_v17 = vrot.slane %v915_v60, %v914_v51  ;;  %v950_v2 = vmul.f32 %v932_v56, %v2471_v47  ;;  %v952_v15 = vmul.f32 %v932_v56, %v2481_v58  ;;  %v949_v22 = vmul.f32 %v928_v43, %v2466_v44 }
 0x1f8   : > { %v951_v12 = vmul.f32 %v928_v43, %v2476_v53  ;;  %v2582_v18 = vmul.f32 %v932_v56, %v2491_v7  ;;  %v2585_v31 = vmul.f32 %v932_v56, %v2501_v16  ;;  %v2588_v38 = vmul.f32 %v928_v43, %v2486_v3 }
 0x1f9   : > { %v924_v28 = vsub.f32 %v903_v0, %v922_v17  ;;  %v2591_v34 = vmul.f32 %v928_v43, %v2496_v10  ;;  %v2594_v47 = vmul.f32 %v932_v56, %v2511_v27  ;;  %v2597_v44 = vmul.f32 %v932_v56, %v2521_v37 }
 0x1fa   : > { %v2600_v53 = vmul.f32 %v928_v43, %v2506_v24  ;;  %v2603_v58 = vmul.f32 %v928_v43, %v2516_v32  ;;  %v2606_v7 = vmul.f32 %v932_v56, %v2531_v52  ;;  %v2609_v3 = vmul.f32 %v928_v43, %v2526_v45 }
 0x1fb   : > { %v2611_v10 = vrot.slane %v924_v28, %v893_v21  ;;  %v2613_v16 = vrot.slane %v924_v28, %v897_v25 }
 0x1fd   : > { %v2616_v27 = vadd.f32 %v2613_v16, %v964_v55  ;;  %v977_v37 = vadd.f32 %v2613_v16, %v934_v59  ;;  %v979_v24 = vadd.f32 %v2613_v16, %v936_v8  ;;  %v976_v32 = vadd.f32 %v2611_v10, %v933_v62 }
 0x1fe   : > { %v978_v19 = vadd.f32 %v2611_v10, %v935_v1  ;;  %v981_v52 = vadd.f32 %v2613_v16, %v938_v57  ;;  %v983_v45 = vadd.f32 %v2613_v16, %v940_v9  ;;  %v980_v20 = vadd.f32 %v2611_v10, %v937_v4 }
 0x1ff   : > { %v1039_v21 = vmax.f32 %v2616_v27, 0.0  ;;  %v1009_v23 = vmax.f32 %v977_v37, 0.0  ;;  %v1011_v25 = vmax.f32 %v979_v24, 0.0  ;;  %v1008_v26 = vmax.f32 %v976_v32, 0.0 }
 0x200   : > { %v1010_v29 = vmax.f32 %v978_v19, 0.0  ;;  %v1013_v30 = vmax.f32 %v981_v52, 0.0  ;;  %v1015_v33 = vmax.f32 %v983_v45, 0.0  ;;  %v982_v35 = vadd.f32 %v2611_v10, %v939_v48 }
 0x201   : > { %v1073_v36 = vpack.c.bf16 %v1011_v25, %v1009_v23  ;;  %v1012_v39 = vmax.f32 %v980_v20, 0.0  ;;  %v985_v40 = vadd.f32 %v2613_v16, %v942_v50  ;;  %v987_v41 = vadd.f32 %v2613_v16, %v944_v11 }
 0x202   : > { %v1072_v42 = vpack.c.bf16 %v1010_v29, %v1008_v26  ;;  %v1075_v43 = vpack.c.bf16 %v1015_v33, %v1013_v30  ;;  %v1014_v46 = vmax.f32 %v982_v35, 0.0  ;;  %v984_v51 = vadd.f32 %v2611_v10, %v941_v13 }
 0x203   : > { %1312 = vmatprep.mubr.bf16.mxu1 %v1073_v36  ;;  %v1017_v56 = vmax.f32 %v985_v40, 0.0  ;;  %v1019_v62 = vmax.f32 %v987_v41, 0.0  ;;  %v986_v1 = vadd.f32 %v2611_v10, %v943_v14  ;;  %v989_v4 = vadd.f32 %v2613_v16, %v946_v49 }
 0x204   : > { %1313 = vmatmul.mubr.bf16.vlgmr.msra.gmra.mrb[0].mxu1 %v1072_v42  ;;  %v1074_v5 = vpack.c.bf16 %v1014_v46, %v1012_v39  ;;  %v1016_v55 = vmax.f32 %v984_v51, 0.0  ;;  %v991_v59 = vadd.f32 %v2613_v16, %v948_v54  ;;  %v988_v8 = vadd.f32 %v2611_v10, %v945_v63 }
 0x205   : > { %1322 = vmatprep.mubr.bf16.mxu1 %v1075_v43  ;;  %v1077_v57 = vpack.c.bf16 %v1019_v62, %v1017_v56  ;;  %v1018_v9 = vmax.f32 %v986_v1, 0.0  ;;  %v1021_v48 = vmax.f32 %v989_v4, 0.0  ;;  %v990_v50 = vadd.f32 %v2611_v10, %v947_v6 }
 0x206   : > { %v1023_v60 = vmax.f32 %v991_v59, 0.0  ;;  %v1020_v11 = vmax.f32 %v988_v8, 0.0  ;;  %v993_v13 = vadd.f32 %v2613_v16, %v950_v2  ;;  %v995_v14 = vadd.f32 %v2613_v16, %v952_v15 }
 0x207   : > { %v1076_v0 = vpack.c.bf16 %v1018_v9, %v1016_v55  ;;  %v1022_v49 = vmax.f32 %v990_v50, 0.0  ;;  %v992_v17 = vadd.f32 %v2611_v10, %v949_v22  ;;  %v994_v54 = vadd.f32 %v2611_v10, %v951_v12 }
 0x208   : > { %v1079_v28 = vpack.c.bf16 %v1023_v60, %v1021_v48  ;;  %v1025_v63 = vmax.f32 %v993_v13, 0.0  ;;  %v1027_v37 = vmax.f32 %v995_v14, 0.0  ;;  %v997_v24 = vadd.f32 %v2613_v16, %v2582_v18 }
 0x209   : > { %v1078_v32 = vpack.c.bf16 %v1022_v49, %v1020_v11  ;;  %v1024_v6 = vmax.f32 %v992_v17, 0.0  ;;  %v1026_v19 = vmax.f32 %v994_v54, 0.0  ;;  %v999_v2 = vadd.f32 %v2613_v16, %v2585_v31 }
 0x20a   : > { %v1081_v52 = vpack.c.bf16 %v1027_v37, %v1025_v63  ;;  %v1029_v15 = vmax.f32 %v997_v24, 0.0  ;;  %v996_v45 = vadd.f32 %v2611_v10, %v2588_v38  ;;  %v998_v22 = vadd.f32 %v2611_v10, %v2591_v34 }
 0x20b   : > { %v1080_v12 = vpack.c.bf16 %v1026_v19, %v1024_v6  ;;  %v1031_v20 = vmax.f32 %v999_v2, 0.0  ;;  %v1001_v23 = vadd.f32 %v2613_v16, %v2594_v47  ;;  %v1003_v18 = vadd.f32 %v2613_v16, %v2597_v44 }
 0x20c   : > { %1323 = vmatmul.mubr.bf16.gmra.mrb[4].mxu1 %v1074_v5  ;;  %v1028_v25 = vmax.f32 %v996_v45, 0.0  ;;  %v1030_v26 = vmax.f32 %v998_v22, 0.0  ;;  %v1000_v31 = vadd.f32 %v2611_v10, %v2600_v53  ;;  %v1002_v38 = vadd.f32 %v2611_v10, %v2603_v58 }
 0x20d   : > { %1332 = vmatprep.mubr.bf16.mxu1 %v1077_v57  ;;  %v1083_v29 = vpack.c.bf16 %v1031_v20, %v1029_v15  ;;  %v1033_v34 = vmax.f32 %v1001_v23, 0.0  ;;  %v1035_v30 = vmax.f32 %v1003_v18, 0.0  ;;  %v1005_v33 = vadd.f32 %v2613_v16, %v2606_v7 }
 0x20e   : > { %v1082_v47 = vpack.c.bf16 %v1030_v26, %v1028_v25  ;;  %v1032_v35 = vmax.f32 %v1000_v31, 0.0  ;;  %v1034_v36 = vmax.f32 %v1002_v38, 0.0  ;;  %v1004_v44 = vadd.f32 %v2611_v10, %v2609_v3 }
 0x20f   : > { %v1085_v39 = vpack.c.bf16 %v1035_v30, %v1033_v34  ;;  %v1037_v40 = vmax.f32 %v1005_v33, 0.0  ;;  %v1006_v53 = vadd.f32 %v2611_v10, %v2554_v61 }
 0x210   : > { %v1084_v41 = vpack.c.bf16 %v1034_v36, %v1032_v35  ;;  %v1036_v58 = vmax.f32 %v1004_v44, 0.0 }
 0x211   : > { %v1087_v42 = vpack.c.bf16 %v1039_v21, %v1037_v40  ;;  %v1038_v43 = vmax.f32 %v1006_v53, 0.0 }
 0x213   : > { %v1086_v46 = vpack.c.bf16 %v1038_v43, %v1036_v58 }
 0x214   : > { %1333 = vmatmul.mubr.bf16.gmra.mrb[8].mxu1 %v1076_v0 }
 0x215   : > { %1342 = vmatprep.mubr.bf16.mxu1 %v1079_v28 }
 0x21c   : > { %1343 = vmatmul.mubr.bf16.gmra.mrb[12].mxu1 %v1078_v32 }
 0x21d   : > { %1352 = vmatprep.mubr.bf16.mxu1 %v1081_v52 }
 0x224   : > { %1353 = vmatmul.mubr.bf16.gmra.mrb[16].mxu1 %v1080_v12 }
 0x225   : > { %1362 = vmatprep.mubr.bf16.mxu1 %v1083_v29 }
 0x22c   : > { %1363 = vmatmul.mubr.bf16.gmra.mrb[20].mxu1 %v1082_v47 }
 0x22d   : > { %1372 = vmatprep.mubr.bf16.mxu1 %v1085_v39 }
 0x234   : > { %1373 = vmatmul.mubr.bf16.gmra.mrb[24].mxu1 %v1084_v41 }
 0x235   : > { %1382 = vmatprep.mubr.bf16.mxu1 %v1087_v42 }
 0x23c   : > { %1383 = vmatmul.mubr.bf16.gmra.mrb[28].mxu1 %v1086_v46 }
 0x2d7   : > { %v1314_v61 = vpop.f32.mrb[0].mxu1 }
 0x2d8   : > { %v1316_v7 = vpop.f32.mrb[1].mxu1  ;;  %1425 = vst [vmem:[%s2664_s14] sm:$0xff] %v1314_v61 }
 0x2d9   : > { %v1318_v3 = vpop.f32.mrb[2].mxu1  ;;  %1426 = vst [vmem:[%s2664_s14 + $0x8] sm:$0xff] %v1316_v7 }
 0x2da   : > { %v1320_v10 = vpop.f32.mrb[3].mxu1  ;;  %1427 = vst [vmem:[%s2664_s14 + $0x10] sm:$0xff] %v1318_v3 }
 0x2db   : > { %1428 = vst [vmem:[%s2664_s14 + $0x18] sm:$0xff] %v1320_v10 }
 0x2df   : > { %v1324_v16 = vpop.f32.mrb[4].mxu1 }
 0x2e0   : > { %v1326_v27 = vpop.f32.mrb[5].mxu1  ;;  %1429 = vst [vmem:[%s2664_s14 + $0x20] sm:$0xff] %v1324_v16 }
 0x2e1   : > { %v1328_v21 = vpop.f32.mrb[6].mxu1  ;;  %1430 = vst [vmem:[%s2664_s14 + $0x28] sm:$0xff] %v1326_v27 }
 0x2e2   : > { %v1330_v51 = vpop.f32.mrb[7].mxu1  ;;  %1431 = vst [vmem:[%s2664_s14 + $0x30] sm:$0xff] %v1328_v21 }
 0x2e3   : > { %1432 = vst [vmem:[%s2664_s14 + $0x38] sm:$0xff] %v1330_v51 }
 0x2e7   : > { %v1334_v56 = vpop.f32.mrb[8].mxu1 }
 0x2e8   : > { %v1336_v62 = vpop.f32.mrb[9].mxu1  ;;  %1433 = vst [vmem:[%s2664_s14 + $0x40] sm:$0xff] %v1334_v56 }
 0x2e9   : > { %v1338_v1 = vpop.f32.mrb[10].mxu1  ;;  %1434 = vst [vmem:[%s2664_s14 + $0x48] sm:$0xff] %v1336_v62 }
 0x2ea   : > { %v1340_v4 = vpop.f32.mrb[11].mxu1  ;;  %1435 = vst [vmem:[%s2664_s14 + $0x50] sm:$0xff] %v1338_v1 }
 0x2eb   : > { %1436 = vst [vmem:[%s2664_s14 + $0x58] sm:$0xff] %v1340_v4 }
 0x2ef   : > { %v1344_v5 = vpop.f32.mrb[12].mxu1 }
 0x2f0   : > { %v1346_v55 = vpop.f32.mrb[13].mxu1  ;;  %1437 = vst [vmem:[%s2664_s14 + $0x60] sm:$0xff] %v1344_v5 }
 0x2f1   : > { %v1348_v59 = vpop.f32.mrb[14].mxu1  ;;  %1438 = vst [vmem:[%s2664_s14 + $0x68] sm:$0xff] %v1346_v55 }
 0x2f2   : > { %v1350_v8 = vpop.f32.mrb[15].mxu1  ;;  %1439 = vst [vmem:[%s2664_s14 + $0x70] sm:$0xff] %v1348_v59 }
 0x2f3   : > { %1440 = vst [vmem:[%s2664_s14 + $0x78] sm:$0xff] %v1350_v8 }
 0x2f7   : > { %v1354_v57 = vpop.f32.mrb[16].mxu1 }
 0x2f8   : > { %v1356_v9 = vpop.f32.mrb[17].mxu1  ;;  %1441 = vst [vmem:[%s2664_s14 + $0x80] sm:$0xff] %v1354_v57 }
 0x2f9   : > { %v1358_v48 = vpop.f32.mrb[18].mxu1  ;;  %1442 = vst [vmem:[%s2664_s14 + $0x88] sm:$0xff] %v1356_v9 }
 0x2fa   : > { %v1360_v50 = vpop.f32.mrb[19].mxu1  ;;  %1443 = vst [vmem:[%s2664_s14 + $0x90] sm:$0xff] %v1358_v48 }
 0x2fb   : > { %1444 = vst [vmem:[%s2664_s14 + $0x98] sm:$0xff] %v1360_v50 }
 0x2ff   : > { %v1364_v60 = vpop.f32.mrb[20].mxu1 }
 0x300   : > { %v1366_v11 = vpop.f32.mrb[21].mxu1  ;;  %1445 = vst [vmem:[%s2664_s14 + $0xa0] sm:$0xff] %v1364_v60 }
 0x301   : > { %v1368_v13 = vpop.f32.mrb[22].mxu1  ;;  %1446 = vst [vmem:[%s2664_s14 + $0xa8] sm:$0xff] %v1366_v11 }
 0x302   : > { %v1370_v14 = vpop.f32.mrb[23].mxu1  ;;  %1447 = vst [vmem:[%s2664_s14 + $0xb0] sm:$0xff] %v1368_v13 }
 0x303   : > { %1448 = vst [vmem:[%s2664_s14 + $0xb8] sm:$0xff] %v1370_v14 }
 0x307   : > { %v1374_v0 = vpop.f32.mrb[24].mxu1 }
 0x308   : > { %v1376_v49 = vpop.f32.mrb[25].mxu1  ;;  %1449 = vst [vmem:[%s2664_s14 + $0xc0] sm:$0xff] %v1374_v0 }
 0x309   : > { %v1378_v17 = vpop.f32.mrb[26].mxu1  ;;  %1450 = vst [vmem:[%s2664_s14 + $0xc8] sm:$0xff] %v1376_v49 }
 0x30a   : > { %v1380_v54 = vpop.f32.mrb[27].mxu1  ;;  %1451 = vst [vmem:[%s2664_s14 + $0xd0] sm:$0xff] %v1378_v17 }
 0x30b   : > { %1452 = vst [vmem:[%s2664_s14 + $0xd8] sm:$0xff] %v1380_v54 }
 0x30f   : > { %v1384_v28 = vpop.f32.mrb[28].mxu1 }
 0x310   : > { %v1386_v63 = vpop.f32.mrb[29].mxu1  ;;  %1453 = vst [vmem:[%s2664_s14 + $0xe0] sm:$0xff] %v1384_v28 }
 0x311   : > { %v1388_v37 = vpop.f32.mrb[30].mxu1  ;;  %1454 = vst [vmem:[%s2664_s14 + $0xe8] sm:$0xff] %v1386_v63 }
 0x312   : > { %v1390_v24 = vpop.f32.mrb[31].mxu1  ;;  %1455 = vst [vmem:[%s2664_s14 + $0xf0] sm:$0xff] %v1388_v37 }
 0x313   : > { %1456 = vst [vmem:[%s2664_s14 + $0xf8] sm:$0xff] %v1390_v24 }
 0x314   : > { %1983 = shalt.err (!%p1980_p12)
}
 0x315   : > { %s1984_s1 = scalar_lea.hbm %s2700_s15, 4096  ;;  %s1988_s6 = scalar_lea.hbm %s2761_s5, 8192 }
 0x316   : > { %p1985_p11 = scmp.ne.s32.totalorder %s2700_s15, %s1984_s1  ;;  %p1989_p8 = scmp.lt.u32.totalorder %s2700_s15, %s2761_s5 }
 0x317   : > { %p1990_p0 = scmp.lt.u32.totalorder %s1988_s6, %s1984_s1  ;;  %p1992_p13 = scmp.lt.u32.totalorder %s1984_s1, %s2700_s15 }
 0x318   : > { %p1986_p9 = pnand %p1985_p11, %p2789_p3 }
 0x319   : > { %p1991_p10 = por %p1990_p0, %p1989_p8 }
 0x31a   : > { %p1987_p5 = pneg %p1986_p9 }
 0x31b   : > { %p1993_p7 = por %p1992_p13, %p1991_p10 }
 0x31d   : > { %p1994_p1 = pnand %p1993_p7, %p1987_p5 }
 0x31f   : > { %1997 = shalt.err (!%p1994_p1)
}
 0x320   : > { %s2067_s13 = smov 256   ;;  %s2068_s9 = smov 16  }
 0x321   : > { %1704 = dma.vmem_to_hbm [thread:$0]  (%p2789_p3), %s2702_s24, 4096, %s2700_s15, %s2709_s21, %s2067_s13, %s2067_s13, %s2068_s9  }
 0x322 PF: > { %s1486_s14 = sand.u32 1, %s2036_s18   ;;  %p2790_p4 = scmp.ne.s32.totalorder %s2778_s12, 0 }
 0x323   : > { %p2791_p2 = scmp.ge.s32.totalorder %s2056_s23, 2  ;;  %s1487_s4 = scalar_lea.sflag [#allocation4], %s1486_s14 }
 0x325   : > { %p1718_p6 = pnand %p2791_p2, %p2790_p4 }
 0x327   : > { %2031 = dma.done.wait (!%p1718_p6), %s1487_s4, 4096  }
 0x328   : > { %2033 = vsyncadd (!%p1718_p6), %s1487_s4, 4294963200  ;;  %s22_s23 = sadd.s32 1, %s2056_s23   ;;  %s2792_s10 = sld [smem:[#allocation12_spill]] }
 0x329   : > { %p19_p12 = scmp.ge.s32.totalorder %s22_s23, 4   ;;  %s2793_s18 = smov %s2040_s19 }
 0x32a   : > { %s2794_s19 = smov %s2044_s20  ;;  %s2795_s20 = smov %s2150_s30 }
 0x32b   : > { %s2796_s21 = smov %s2052_s22  ;;  %21 = sbr.rel (!%p19_p12) target bundleno = 10 (0xa), region = 111 }
 0x32e   : > { %s2797_s22 = smov %s2792_s10 }
 0x332   :  { %1492 = vsyncpa [#allocation3], 1 }
 0x333   :  { %1494 = vsyncpa [#allocation3 + $0x1], 1 }
 0x334   :  { %1495 = vsyncpa [#allocation6], 1 }
 0x335   :  { %1497 = vsyncpa [#allocation6 + $0x1], 1 }
 0x336   :  { %1498 = vsyncpa [#allocation4], 1 }
 0x337   :  { %1500 = vsyncpa [#allocation4 + $0x1], 1 }

</bundles_post_ra>
